<compile_context>
chip_gen: v7x
topology: tpu7x:2x2x1
jax: 0.10.0
libtpu: 0.0.40
codegen_flags: <defaults>
</compile_context>

<pallas_src>
import functools

import jax
import jax.numpy as jnp
from jax.experimental import pallas as pl
from jax.experimental.pallas import tpu as pltpu

EPS = 1e-5  # nn.BatchNorm2d default eps


def _pass1_kernel(p_ref, w_ref, g_ref, b_ref,          # inputs
                  y_ref, scale_ref, shift_ref,          # outputs
                  sum_ref, sq_ref,                      # VMEM scratch
                  *, inv_m):
    i = pl.program_id(0)

    @pl.when(i == 0)
    def _init():
        sum_ref[...] = jnp.zeros_like(sum_ref)
        sq_ref[...] = jnp.zeros_like(sq_ref)

    # bf16 operands on the MXU, f32 accumulation.
    y = jnp.dot(p_ref[...], w_ref[...], preferred_element_type=jnp.float32)
    y_ref[...] = y

    # Per-channel running sums for BatchNorm (f32, global over M).
    sum_ref[...] += jnp.sum(y, axis=0, keepdims=True)
    sq_ref[...] += jnp.sum(y * y, axis=0, keepdims=True)

    @pl.when(i == pl.num_programs(0) - 1)
    def _finalize():
        mean = sum_ref[...] * inv_m
        var = jnp.maximum(sq_ref[...] * inv_m - mean * mean, 0.0)
        scale = g_ref[...] * jax.lax.rsqrt(var + EPS)
        scale_ref[...] = scale
        shift_ref[...] = b_ref[...] - mean * scale


def _pass2_kernel(y_ref, scale_ref, shift_ref, o_ref):
    # Folded BatchNorm affine: one multiply + one add per element.
    o_ref[...] = y_ref[...] * scale_ref[...] + shift_ref[...]


def conv_transpose_norm2d(x, weight, bias, gamma, beta, *,
                          stride, padding, output_padding, dilation,
                          tile_m=512):
    N, C_in, H, W = x.shape
    C_in_w, C_out, kH, kW = weight.shape
    assert C_in_w == C_in
    sH, sW = stride
    pH, pW = padding
    opH, opW = output_padding
    dH, dW = dilation

    H_out = (H - 1) * sH - 2 * pH + dH * (kH - 1) + opH + 1
    W_out = (W - 1) * sW - 2 * pW + dW * (kW - 1) + opW + 1

    # --- glue: lhs-dilated, padded NHWC tensor -----------------------------
    x_nhwc = jnp.transpose(x, (0, 2, 3, 1))
    Hup = (H - 1) * sH + 1
    Wup = (W - 1) * sW + 1
    x_up = jnp.zeros((N, Hup, Wup, C_in), x.dtype).at[:, ::sH, ::sW, :].set(x_nhwc)
    pbH = dH * (kH - 1) - pH
    pbW = dW * (kW - 1) - pW
    assert pbH >= 0 and pbW >= 0  # TODO(synk): negative effective pad (crop) unsupported
    x_pad = jnp.pad(x_up, ((0, 0), (pbH, pbH + opH), (pbW, pbW + opW), (0, 0)))

    # --- glue: im2col (static slices) --------------------------------------
    cols = []
    for kh in range(kH):
        for kw in range(kW):
            cols.append(x_pad[:, kh * dH:kh * dH + H_out, kw * dW:kw * dW + W_out, :])
    patches = jnp.stack(cols, axis=3)                  # (N, Ho, Wo, kH*kW, C_in)
    M = N * H_out * W_out
    Kdim = kH * kW * C_in
    # bf16 MXU operands; K/C are NOT padded to 128 (Mosaic pads in VMEM).
    patches = patches.reshape(M, Kdim).astype(jnp.bfloat16)

    # ConvTranspose weight -> equivalent forward-conv matrix, order (kh, kw, ci).
    w_flip = weight[:, :, ::-1, ::-1]                  # (C_in, C_out, kH, kW)
    w_mat = jnp.transpose(w_flip, (2, 3, 0, 1)).reshape(Kdim, C_out).astype(jnp.bfloat16)

    g_row = gamma.reshape(1, C_out).astype(jnp.float32)
    be_row = beta.reshape(1, C_out).astype(jnp.float32)
    # Conv bias cancels exactly under BatchNorm mean subtraction -> dropped.
    del bias

    # --- tiling over M ------------------------------------------------------
    TM = max(8, min(tile_m, ((M + 7) // 8) * 8))
    TM = (TM // 8) * 8
    Mp = ((M + TM - 1) // TM) * TM
    if Mp != M:
        # Zero rows contribute exactly 0 to sum/sumsq -> stats stay exact
        # (normalization uses the true M below).
        patches = jnp.pad(patches, ((0, Mp - M), (0, 0)))
    n_tiles = Mp // TM

    # --- pass 1: matmul + global BN statistics (accumulator over M axis) ---
    y_flat, scale, shift = pl.pallas_call(
        functools.partial(_pass1_kernel, inv_m=1.0 / M),
        out_shape=(
            jax.ShapeDtypeStruct((Mp, C_out), jnp.float32),
            jax.ShapeDtypeStruct((1, C_out), jnp.float32),
            jax.ShapeDtypeStruct((1, C_out), jnp.float32),
        ),
        grid=(n_tiles,),
        in_specs=[
            pl.BlockSpec((TM, Kdim), lambda i: (i, 0)),      # patches tile
            pl.BlockSpec((Kdim, C_out), lambda i: (0, 0)),   # weight (resident)
            pl.BlockSpec((1, C_out), lambda i: (0, 0)),      # gamma
            pl.BlockSpec((1, C_out), lambda i: (0, 0)),      # beta
        ],
        out_specs=(
            pl.BlockSpec((TM, C_out), lambda i: (i, 0)),     # y tiles
            pl.BlockSpec((1, C_out), lambda i: (0, 0)),      # scale (last step)
            pl.BlockSpec((1, C_out), lambda i: (0, 0)),      # shift (last step)
        ),
        scratch_shapes=[
            pltpu.VMEM((1, C_out), jnp.float32),             # sum
            pltpu.VMEM((1, C_out), jnp.float32),             # sum of squares
        ],
        compiler_params=pltpu.CompilerParams(
            dimension_semantics=("arbitrary",)),
    )(patches, w_mat, g_row, be_row)

    # --- pass 2: apply folded BN affine, tiled / pipelined over M ----------
    out_flat = pl.pallas_call(
        _pass2_kernel,
        out_shape=jax.ShapeDtypeStruct((Mp, C_out), jnp.float32),
        grid=(n_tiles,),
        in_specs=[
            pl.BlockSpec((TM, C_out), lambda i: (i, 0)),
            pl.BlockSpec((1, C_out), lambda i: (0, 0)),
            pl.BlockSpec((1, C_out), lambda i: (0, 0)),
        ],
        out_specs=pl.BlockSpec((TM, C_out), lambda i: (i, 0)),
        compiler_params=pltpu.CompilerParams(
            dimension_semantics=("parallel",)),
    )(y_flat, scale, shift)

    out = out_flat[:M].reshape(N, H_out, W_out, C_out)
    return jnp.transpose(out, (0, 3, 1, 2))            # back to NCHW


def reference(x, weight, bias, gamma, beta, *, stride, padding, output_padding, dilation):
    sH, sW = stride
    pH, pW = padding
    opH, opW = output_padding
    dH, dW = dilation
    kH, kW = weight.shape[2], weight.shape[3]
    w_flip = weight[:, :, ::-1, ::-1]                  # (C_in, C_out, kH, kW)
    y = jax.lax.conv_general_dilated(
        x, w_flip,
        window_strides=(1, 1),
        padding=[(dH * (kH - 1) - pH, dH * (kH - 1) - pH + opH),
                 (dW * (kW - 1) - pW, dW * (kW - 1) - pW + opW)],
        lhs_dilation=(sH, sW),
        rhs_dilation=(dH, dW),
        dimension_numbers=('NCHW', 'IOHW', 'NCHW'),
        precision=jax.lax.Precision.HIGHEST)
    y = y + bias[None, :, None, None]
    mean = jnp.mean(y, axis=(0, 2, 3), keepdims=True)
    var = jnp.mean((y - mean) ** 2, axis=(0, 2, 3), keepdims=True)
    return ((y - mean) * jax.lax.rsqrt(var + EPS)
            * gamma[None, :, None, None] + beta[None, :, None, None])


if __name__ == "__main__":
    key = jax.random.PRNGKey(0)
    k1, k2, k3, k4, k5 = jax.random.split(key, 5)

    # ConvTransposeNorm2d(in_channels=4, out_channels=8, kernel_size=3,
    #                     stride=2, padding=1, output_padding=1)
    N, C_in, H, W = 2, 4, 16, 16
    C_out, k, s, p, op, d = 8, 3, 2, 1, 1, 1

    x = jax.random.normal(k1, (N, C_in, H, W), jnp.float32)
    # nn.ConvTranspose2d weight shape: (in_channels, out_channels/groups, kH, kW)
    weight = 0.1 * jax.random.normal(k2, (C_in, C_out, k, k), jnp.float32)
    bias = 0.1 * jax.random.normal(k3, (C_out,), jnp.float32)
    # nn.BatchNorm2d affine params (deterministic, non-trivial)
    gamma = 1.0 + 0.1 * jax.random.normal(k4, (C_out,), jnp.float32)
    beta = 0.1 * jax.random.normal(k5, (C_out,), jnp.float32)

    args = dict(stride=(s, s), padding=(p, p),
                output_padding=(op, op), dilation=(d, d))

    out = conv_transpose_norm2d(x, weight, bias, gamma, beta, **args)
    out = jax.block_until_ready(out)

    H_out = (H - 1) * s - 2 * p + d * (k - 1) + op + 1
    assert out.shape == (N, C_out, H_out, H_out), out.shape

    ref = reference(x, weight, bias, gamma, beta, **args)
    # bf16 MXU operands vs f32 reference -> bf16-appropriate tolerance
    # (BN divides by a small batch std, which amplifies absolute error).
    err = float(jnp.max(jnp.abs(out - ref)))
    assert jnp.allclose(out, ref, atol=3e-2, rtol=3e-2), err

    print("KERNEL_OK")
</pallas_src>

<mosaic_0001>
module attributes {stable_mosaic.version = 11 : i64} {
  func.func @_pass1_kernel(%arg0: i32, %arg1: memref<512x36xbf16, #tpu.memory_space<vmem>>, %arg2: memref<36x8xbf16, #tpu.memory_space<vmem>>, %arg3: memref<1x8xf32, #tpu.memory_space<vmem>>, %arg4: memref<1x8xf32, #tpu.memory_space<vmem>>, %arg5: memref<512x8xf32, #tpu.memory_space<vmem>>, %arg6: memref<1x8xf32, #tpu.memory_space<vmem>>, %arg7: memref<1x8xf32, #tpu.memory_space<vmem>>, %arg8: memref<1x8xf32, #tpu.memory_space<vmem>>, %arg9: memref<1x8xf32, #tpu.memory_space<vmem>>) attributes {dimension_semantics = [#tpu.dimension_semantics<arbitrary>], iteration_bounds = array<i64: 4>, scalar_prefetch = 0 : i64, scratch_operands = 2 : i64, tpu.core_type = #tpu.core_type<tc>, window_params = [{transform_indices = @transform_0, window_bounds = array<i64: 512, 36>}, {pipeline_mode = #tpu.pipeline_mode<synchronous>, transform_indices = @transform_1, window_bounds = array<i64: 36, 8>}, {pipeline_mode = #tpu.pipeline_mode<synchronous>, transform_indices = @transform_2, window_bounds = array<i64: 1, 8>}, {pipeline_mode = #tpu.pipeline_mode<synchronous>, transform_indices = @transform_3, window_bounds = array<i64: 1, 8>}, {transform_indices = @transform_4, window_bounds = array<i64: 512, 8>}, {pipeline_mode = #tpu.pipeline_mode<synchronous>, transform_indices = @transform_5, window_bounds = array<i64: 1, 8>}, {pipeline_mode = #tpu.pipeline_mode<synchronous>, transform_indices = @transform_6, window_bounds = array<i64: 1, 8>}]} {
    %c0_i32 = arith.constant 0 : i32
    %0 = arith.cmpi eq, %arg0, %c0_i32 : i32
    %1 = arith.extui %0 : i1 to i32
    %c0_i32_0 = arith.constant 0 : i32
    %2 = arith.cmpi ne, %1, %c0_i32_0 : i32
    scf.if %2 {
      %cst_17 = arith.constant 0.000000e+00 : f32
      %21 = vector.broadcast %cst_17 : f32 to vector<1x8xf32>
      %c0_18 = arith.constant 0 : index
      %c0_19 = arith.constant 0 : index
      %22 = vector.load %arg8[%c0_18, %c0_19] : memref<1x8xf32, #tpu.memory_space<vmem>>, vector<1x8xf32>
      tpu.vector_store %arg8[%c0_18, %c0_19], %21 {strides = array<i32>} : memref<1x8xf32, #tpu.memory_space<vmem>>, vector<1x8xf32>,
      %cst_20 = arith.constant 0.000000e+00 : f32
      %23 = vector.broadcast %cst_20 : f32 to vector<1x8xf32>
      %c0_21 = arith.constant 0 : index
      %c0_22 = arith.constant 0 : index
      %24 = vector.load %arg9[%c0_21, %c0_22] : memref<1x8xf32, #tpu.memory_space<vmem>>, vector<1x8xf32>
      tpu.vector_store %arg9[%c0_21, %c0_22], %23 {strides = array<i32>} : memref<1x8xf32, #tpu.memory_space<vmem>>, vector<1x8xf32>,
    } else {
    }
    %c0 = arith.constant 0 : index
    %c0_1 = arith.constant 0 : index
    %3 = vector.load %arg1[%c0, %c0_1] : memref<512x36xbf16, #tpu.memory_space<vmem>>, vector<512x36xbf16>
    %c0_2 = arith.constant 0 : index
    %c0_3 = arith.constant 0 : index
    %4 = vector.load %arg2[%c0_2, %c0_3] : memref<36x8xbf16, #tpu.memory_space<vmem>>, vector<36x8xbf16>
    %cst = arith.constant dense<0.000000e+00> : vector<512x8xf32>
    %5 = tpu.matmul %3, %4, %cst {dimension_numbers = #tpu.dot_dimension_numbers<[1], [0], [0], [1], [0, 0, 1, 1], [], []>} : vector<512x36xbf16>, vector<36x8xbf16>, vector<512x8xf32> -> vector<512x8xf32>
    %c0_4 = arith.constant 0 : index
    %c0_5 = arith.constant 0 : index
    %6 = vector.load %arg5[%c0_4, %c0_5] : memref<512x8xf32, #tpu.memory_space<vmem>>, vector<512x8xf32>
    tpu.vector_store %arg5[%c0_4, %c0_5], %5 {strides = array<i32>} : memref<512x8xf32, #tpu.memory_space<vmem>>, vector<512x8xf32>,
    %c0_6 = arith.constant 0 : index
    %c0_7 = arith.constant 0 : index
    %7 = vector.load %arg8[%c0_6, %c0_7] : memref<1x8xf32, #tpu.memory_space<vmem>>, vector<1x8xf32>
    %cst_8 = arith.constant dense<0.000000e+00> : vector<8xf32>
    %8 = vector.multi_reduction <add>, %5, %cst_8 [0] : vector<512x8xf32> to vector<8xf32>
    %9 = vector.shape_cast %8 : vector<8xf32> to vector<1x8xf32>
    %10 = arith.addf %7, %9 : vector<1x8xf32>
    %c0_9 = arith.constant 0 : index
    %c0_10 = arith.constant 0 : index
    %11 = vector.load %arg8[%c0_9, %c0_10] : memref<1x8xf32, #tpu.memory_space<vmem>>, vector<1x8xf32>
    tpu.vector_store %arg8[%c0_9, %c0_10], %10 {strides = array<i32>} : memref<1x8xf32, #tpu.memory_space<vmem>>, vector<1x8xf32>,
    %c0_11 = arith.constant 0 : index
    %c0_12 = arith.constant 0 : index
    %12 = vector.load %arg9[%c0_11, %c0_12] : memref<1x8xf32, #tpu.memory_space<vmem>>, vector<1x8xf32>
    %13 = arith.mulf %5, %5 : vector<512x8xf32>
    %cst_13 = arith.constant dense<0.000000e+00> : vector<8xf32>
    %14 = vector.multi_reduction <add>, %13, %cst_13 [0] : vector<512x8xf32> to vector<8xf32>
    %15 = vector.shape_cast %14 : vector<8xf32> to vector<1x8xf32>
    %16 = arith.addf %12, %15 : vector<1x8xf32>
    %c0_14 = arith.constant 0 : index
    %c0_15 = arith.constant 0 : index
    %17 = vector.load %arg9[%c0_14, %c0_15] : memref<1x8xf32, #tpu.memory_space<vmem>>, vector<1x8xf32>
    tpu.vector_store %arg9[%c0_14, %c0_15], %16 {strides = array<i32>} : memref<1x8xf32, #tpu.memory_space<vmem>>, vector<1x8xf32>,
    %c3_i32 = arith.constant 3 : i32
    %18 = arith.cmpi eq, %arg0, %c3_i32 : i32
    %19 = arith.extui %18 : i1 to i32
    %c0_i32_16 = arith.constant 0 : i32
    %20 = arith.cmpi ne, %19, %c0_i32_16 : i32
    scf.if %20 {
      %c0_17 = arith.constant 0 : index
      %c0_18 = arith.constant 0 : index
      %21 = vector.load %arg8[%c0_17, %c0_18] : memref<1x8xf32, #tpu.memory_space<vmem>>, vector<1x8xf32>
      %cst_19 = arith.constant 4.8828125E-4 : f32
      %22 = vector.broadcast %cst_19 : f32 to vector<1x8xf32>
      %23 = arith.mulf %21, %22 : vector<1x8xf32>
      %c0_20 = arith.constant 0 : index
      %c0_21 = arith.constant 0 : index
      %24 = vector.load %arg9[%c0_20, %c0_21] : memref<1x8xf32, #tpu.memory_space<vmem>>, vector<1x8xf32>
      %cst_22 = arith.constant 4.8828125E-4 : f32
      %25 = vector.broadcast %cst_22 : f32 to vector<1x8xf32>
      %26 = arith.mulf %24, %25 : vector<1x8xf32>
      %27 = arith.mulf %23, %23 : vector<1x8xf32>
      %28 = arith.subf %26, %27 : vector<1x8xf32>
      %cst_23 = arith.constant 0.000000e+00 : f32
      %29 = vector.broadcast %cst_23 : f32 to vector<1x8xf32>
      %30 = arith.maximumf %28, %29 : vector<1x8xf32>
      %c0_24 = arith.constant 0 : index
      %c0_25 = arith.constant 0 : index
      %31 = vector.load %arg3[%c0_24, %c0_25] : memref<1x8xf32, #tpu.memory_space<vmem>>, vector<1x8xf32>
      %cst_26 = arith.constant 9.99999974E-6 : f32
      %32 = vector.broadcast %cst_26 : f32 to vector<1x8xf32>
      %33 = arith.addf %30, %32 : vector<1x8xf32>
      %34 = math.rsqrt %33 : vector<1x8xf32>
      %35 = arith.mulf %31, %34 : vector<1x8xf32>
      %c0_27 = arith.constant 0 : index
      %c0_28 = arith.constant 0 : index
      %36 = vector.load %arg6[%c0_27, %c0_28] : memref<1x8xf32, #tpu.memory_space<vmem>>, vector<1x8xf32>
      tpu.vector_store %arg6[%c0_27, %c0_28], %35 {strides = array<i32>} : memref<1x8xf32, #tpu.memory_space<vmem>>, vector<1x8xf32>,
      %c0_29 = arith.constant 0 : index
      %c0_30 = arith.constant 0 : index
      %37 = vector.load %arg4[%c0_29, %c0_30] : memref<1x8xf32, #tpu.memory_space<vmem>>, vector<1x8xf32>
      %38 = arith.mulf %23, %35 : vector<1x8xf32>
      %39 = arith.subf %37, %38 : vector<1x8xf32>
      %c0_31 = arith.constant 0 : index
      %c0_32 = arith.constant 0 : index
      %40 = vector.load %arg7[%c0_31, %c0_32] : memref<1x8xf32, #tpu.memory_space<vmem>>, vector<1x8xf32>
      tpu.vector_store %arg7[%c0_31, %c0_32], %39 {strides = array<i32>} : memref<1x8xf32, #tpu.memory_space<vmem>>, vector<1x8xf32>,
    } else {
    }
    return
  }
  func.func @transform_0(%arg0: i32) -> (i32, i32) {
    %c0_i32 = arith.constant 0 : i32
    %c0_i32_0 = arith.constant 0 : i32
    return %arg0, %c0_i32 : i32, i32
  }
  func.func @transform_1(%arg0: i32) -> (i32, i32) {
    %c0_i32 = arith.constant 0 : i32
    %c0_i32_0 = arith.constant 0 : i32
    %c0_i32_1 = arith.constant 0 : i32
    return %c0_i32, %c0_i32_0 : i32, i32
  }
  func.func @transform_2(%arg0: i32) -> (i32, i32) {
    %c0_i32 = arith.constant 0 : i32
    %c0_i32_0 = arith.constant 0 : i32
    %c0_i32_1 = arith.constant 0 : i32
    return %c0_i32, %c0_i32_0 : i32, i32
  }
  func.func @transform_3(%arg0: i32) -> (i32, i32) {
    %c0_i32 = arith.constant 0 : i32
    %c0_i32_0 = arith.constant 0 : i32
    %c0_i32_1 = arith.constant 0 : i32
    return %c0_i32, %c0_i32_0 : i32, i32
  }
  func.func @transform_4(%arg0: i32) -> (i32, i32) {
    %c0_i32 = arith.constant 0 : i32
    %c0_i32_0 = arith.constant 0 : i32
    return %arg0, %c0_i32 : i32, i32
  }
  func.func @transform_5(%arg0: i32) -> (i32, i32) {
    %c0_i32 = arith.constant 0 : i32
    %c0_i32_0 = arith.constant 0 : i32
    %c0_i32_1 = arith.constant 0 : i32
    return %c0_i32, %c0_i32_0 : i32, i32
  }
  func.func @transform_6(%arg0: i32) -> (i32, i32) {
    %c0_i32 = arith.constant 0 : i32
    %c0_i32_0 = arith.constant 0 : i32
    %c0_i32_1 = arith.constant 0 : i32
    return %c0_i32, %c0_i32_0 : i32, i32
  }
}

</mosaic_0001>

<bundles_post_ra>
// kernel: tpu_custom_call.1
= control target key start
LH: loop header
LB: loop body
LE: loop exit
PB: predicated region body
PF: predicated region fallthrough
CT: control target
= control target key end

     0   :  { %12 = vsyncpa [#allocation5], 0  ;;  %s2383_s0 = inlined_call_operand.vmem [shape: bf16[2048,36], index: 0, kind: input, shape index: {}]   ;;  %s2384_s1 = inlined_call_operand.vmem [shape: bf16[36,8], index: 1, kind: input, shape index: {}]   ;;  %s2385_s2 = inlined_call_operand.vmem [shape: f32[1,8], index: 2, kind: input, shape index: {}]   ;;  %s2386_s3 = inlined_call_operand.vmem [shape: f32[1,8], index: 3, kind: input, shape index: {}]   ;;  %s2387_s4 = inlined_call_operand.vmem [shape: f32[2048,8], index: 4, kind: output, shape index: {0}]   ;;  %s2388_s5 = inlined_call_operand.hbm [shape: f32[1,8], index: 5, kind: output, shape index: {1}]   ;;  %s2389_s6 = inlined_call_operand.hbm [shape: f32[1,8], index: 6, kind: output, shape index: {2}]  }
   0x1   :  { %13 = vsyncpa [#allocation7], 0  ;;  %s1781_s21 = smov 0  }
   0x2 LB: > { %s1787_s22 = sadd.s32 4294967295, %s1741_s21   ;;  %p1422_p0 = scmp.ge.s32.totalorder %s1741_s21, 1  ;;  %s1741_s21 = sphi %s1781_s21, %s19_s21  }
   0x3   : > { %p210_p1 = scmp.lt.s32.totalorder %s1741_s21, 5 }
   0x5   : > { %p211_p2 = pnand %p1422_p0, %p210_p1 }
   0x6   : > { %s1423_s23 = sshll.u32 (!%p211_p2), %s1787_s22, 6  ;;  %p1427_p4 = scmp.ne.s32.totalorder (!%p211_p2), %s1787_s22, 0 }
   0x7   : > { %214 = sbr.rel (%p211_p2) target bundleno = 474 (0x1da), region = 36  ;;  %p241_p3 = scmp.lt.s32.totalorder (!%p211_p2), %s1423_s23, 255 }
   0xe   : > { %s2391_s23 = smov (!%p241_p3, %s1423_s23), 255  ;;  %256 = sbr.rel (%p1427_p4) target bundleno = 21 (0x15), region = 40 }
   0xf   : > { %s1424_s24 = sshll.u32 %s2391_s23, 2  ;;  %s1426_s25 = sshll.u32 %s2391_s23, 3  ;;  %vm257_vm0 = vcmask (!%p1427_p4), 57344   ;;  %v1743_v0 = vmov (!%p1427_p4), 0.0  }
  0x10   : > { %s1795_s28 = scalar_lea.vmem %s2383_s0, %s1424_s24  ;;  %s1800_s7 = scalar_lea.vmem %s2387_s4, %s1426_s25  ;;  %258 = vst.msk [vmem:[#allocation2] sm:$0x1] (!%p1427_p4), %vm257_vm0, %v1743_v0  ;;  %259 = vst.msk [vmem:[#allocation3] sm:$0x1] (!%p1427_p4), %vm257_vm0, %v1743_v0 }
  0x15 PF: > { %v1638_v1 = vld [vmem:[%s2384_s1] sm:$0xff]   ;;  %v1639_v2 = vld [vmem:[%s2384_s1 + $0x8] sm:$0xff]   ;;  %vm504_vm1 = vcmask 293888   ;;  %v1640_v3 = vld [vmem:[%s2384_s1 + $0x10] ss:$0 sps:$4 sm:$0x33]  }
  0x16   : > { %1537 = vmatprep.subr.bf16.mxu0 %v1638_v1  ;;  %v1641_v4 = vld [vmem:[%s1795_s28] sm:$0xff]   ;;  %1607 = vmatprep.subr.bf16.mxu1 %v1638_v1  ;;  %vm601_vm2 = vcmask 1041408   ;;  %v1642_v6 = vld [vmem:[%s1795_s28 + $0x8] sm:$0xff]   ;;  %v1643_v7 = vld [vmem:[%s1795_s28 + $0x10] sm:$0xff]   ;;  %vm894_vm3 = vcmask 64512   ;;  %vm1094_vm4 = vcmask 57344  }
  0x17   : > { %1538 = vmatpush3.bf16.msra.mxu0 %v1638_v1  ;;  %1610 = vmatpush3.bf16.msra.mxu1 %v1638_v1  ;;  %v603_v5 = vsel %vm601_vm2, %v1640_v3, 0  ;;  %v1644_v8 = vld [vmem:[%s1795_s28 + $0x18] sm:$0xff]   ;;  %v1645_v9 = vld [vmem:[%s1795_s28 + $0x20] sm:$0xff]   ;;  %v1658_v11 = vld [vmem:[%s1795_s28 + $0x88] sm:$0xff]   ;;  %p1495_p5 = scmp.ne.s32.totalorder %s1787_s22, 3 }
  0x18   : > { %1539 = vmatprep.subr.bf16.mxu0 %v1639_v2  ;;  %1543 = vmatprep.mubr.msk.bf16.mxu0 %vm504_vm1, %v1641_v4  ;;  %v1657_v10 = vld [vmem:[%s1795_s28 + $0x80] sm:$0xff]   ;;  %v1659_v12 = vld [vmem:[%s1795_s28 + $0x90] sm:$0xff]   ;;  %v1646_v13 = vld [vmem:[%s1795_s28 + $0x28] sm:$0xff]  }
  0x19   : > { %1608 = vmatprep.subr.bf16.mxu1 %v1639_v2  ;;  %1575 = vmatprep.mubr.msk.bf16.mxu1 %vm504_vm1, %v1657_v10  ;;  %v1647_v14 = vld [vmem:[%s1795_s28 + $0x30] sm:$0xff]   ;;  %v1660_v15 = vld [vmem:[%s1795_s28 + $0x98] sm:$0xff]   ;;  %v1661_v16 = vld [vmem:[%s1795_s28 + $0xa0] sm:$0xff]  }
  0x1a   : > { %v1648_v17 = vld [vmem:[%s1795_s28 + $0x38] sm:$0xff]   ;;  %v1662_v18 = vld [vmem:[%s1795_s28 + $0xa8] sm:$0xff]   ;;  %v1649_v19 = vld [vmem:[%s1795_s28 + $0x40] sm:$0xff]  }
  0x1b   : > { %1540 = vmatpush3.bf16.msra.mxu0 %v1639_v2  ;;  %1611 = vmatpush3.bf16.msra.mxu1 %v1639_v2  ;;  %v1663_v20 = vld [vmem:[%s1795_s28 + $0xb0] sm:$0xff]   ;;  %v1650_v21 = vld [vmem:[%s1795_s28 + $0x48] sm:$0xff]   ;;  %v1664_v22 = vld [vmem:[%s1795_s28 + $0xb8] sm:$0xff]  }
  0x1c   : > { %1613 = vmatprep.subr.msk.bf16.mxu0 %vm601_vm2, %v1640_v3  ;;  %1614 = vmatprep.subr.msk.bf16.mxu1 %vm601_vm2, %v1640_v3  ;;  %v1651_v23 = vld [vmem:[%s1795_s28 + $0x50] sm:$0xff]   ;;  %v1665_v24 = vld [vmem:[%s1795_s28 + $0xc0] sm:$0xff]   ;;  %v1652_v25 = vld [vmem:[%s1795_s28 + $0x58] sm:$0xff]  }
  0x1d   : > { %v1666_v26 = vld [vmem:[%s1795_s28 + $0xc8] sm:$0xff]   ;;  %v1653_v27 = vld [vmem:[%s1795_s28 + $0x60] sm:$0xff]   ;;  %v1667_v28 = vld [vmem:[%s1795_s28 + $0xd0] sm:$0xff]  }
  0x1e   : > { %v1654_v29 = vld [vmem:[%s1795_s28 + $0x68] sm:$0xff]   ;;  %v1668_v30 = vld [vmem:[%s1795_s28 + $0xd8] sm:$0xff]   ;;  %v1655_v31 = vld [vmem:[%s1795_s28 + $0x70] sm:$0xff]  }
  0x1f   : > { %1542 = vmatpush3.bf16.msra.mxu0 %v603_v5  ;;  %1612 = vmatpush3.bf16.msra.mxu1 %v603_v5  ;;  %v1669_v32 = vld [vmem:[%s1795_s28 + $0xe0] sm:$0xff]   ;;  %v1656_v33 = vld [vmem:[%s1795_s28 + $0x78] sm:$0xff]   ;;  %v1670_v34 = vld [vmem:[%s1795_s28 + $0xe8] sm:$0xff]  }
  0x20   : > { %v1671_v35 = vld [vmem:[%s1795_s28 + $0xf0] sm:$0xff]   ;;  %v1672_v36 = vld [vmem:[%s1795_s28 + $0xf8] sm:$0xff]  }
  0x22   : > { %1544 = vmatmul.mubr.msk.bf16.vlgmr.msra.gmra.mrb[0].mxu0 %vm504_vm1, %v1642_v6  ;;  %1576 = vmatmul.mubr.msk.bf16.vlgmr.msra.gmra.mrb[0].mxu1 %vm504_vm1, %v1658_v11 }
  0x23   : > { %1547 = vmatprep.mubr.msk.bf16.mxu0 %vm504_vm1, %v1643_v7  ;;  %1579 = vmatprep.mubr.msk.bf16.mxu1 %vm504_vm1, %v1659_v12 }
  0x2a   : > { %1548 = vmatmul.mubr.msk.bf16.gmra.mrb[4].mxu0 %vm504_vm1, %v1644_v8  ;;  %1580 = vmatmul.mubr.msk.bf16.gmra.mrb[4].mxu1 %vm504_vm1, %v1660_v15 }
  0x2b   : > { %1551 = vmatprep.mubr.msk.bf16.mxu0 %vm504_vm1, %v1645_v9  ;;  %1583 = vmatprep.mubr.msk.bf16.mxu1 %vm504_vm1, %v1661_v16 }
  0x32   : > { %1552 = vmatmul.mubr.msk.bf16.gmra.mrb[8].mxu0 %vm504_vm1, %v1646_v13  ;;  %1584 = vmatmul.mubr.msk.bf16.gmra.mrb[8].mxu1 %vm504_vm1, %v1662_v18 }
  0x33   : > { %1555 = vmatprep.mubr.msk.bf16.mxu0 %vm504_vm1, %v1647_v14  ;;  %1587 = vmatprep.mubr.msk.bf16.mxu1 %vm504_vm1, %v1663_v20 }
  0x3a   : > { %1556 = vmatmul.mubr.msk.bf16.gmra.mrb[12].mxu0 %vm504_vm1, %v1648_v17  ;;  %1588 = vmatmul.mubr.msk.bf16.gmra.mrb[12].mxu1 %vm504_vm1, %v1664_v22 }
  0x3b   : > { %1559 = vmatprep.mubr.msk.bf16.mxu0 %vm504_vm1, %v1649_v19  ;;  %1591 = vmatprep.mubr.msk.bf16.mxu1 %vm504_vm1, %v1665_v24 }
  0x42   : > { %1560 = vmatmul.mubr.msk.bf16.gmra.mrb[16].mxu0 %vm504_vm1, %v1650_v21  ;;  %1592 = vmatmul.mubr.msk.bf16.gmra.mrb[16].mxu1 %vm504_vm1, %v1666_v26 }
  0x43   : > { %1563 = vmatprep.mubr.msk.bf16.mxu0 %vm504_vm1, %v1651_v23  ;;  %1595 = vmatprep.mubr.msk.bf16.mxu1 %vm504_vm1, %v1667_v28 }
  0x4a   : > { %1564 = vmatmul.mubr.msk.bf16.gmra.mrb[20].mxu0 %vm504_vm1, %v1652_v25  ;;  %1596 = vmatmul.mubr.msk.bf16.gmra.mrb[20].mxu1 %vm504_vm1, %v1668_v30 }
  0x4b   : > { %1567 = vmatprep.mubr.msk.bf16.mxu0 %vm504_vm1, %v1653_v27  ;;  %1599 = vmatprep.mubr.msk.bf16.mxu1 %vm504_vm1, %v1669_v32 }
  0x52   : > { %1568 = vmatmul.mubr.msk.bf16.gmra.mrb[24].mxu0 %vm504_vm1, %v1654_v29  ;;  %1600 = vmatmul.mubr.msk.bf16.gmra.mrb[24].mxu1 %vm504_vm1, %v1670_v34 }
  0x53   : > { %1571 = vmatprep.mubr.msk.bf16.mxu0 %vm504_vm1, %v1655_v31  ;;  %1603 = vmatprep.mubr.msk.bf16.mxu1 %vm504_vm1, %v1671_v35 }
  0x5a   : > { %1572 = vmatmul.mubr.msk.bf16.gmra.mrb[28].mxu0 %vm504_vm1, %v1656_v33  ;;  %1604 = vmatmul.mubr.msk.bf16.gmra.mrb[28].mxu1 %vm504_vm1, %v1672_v36 }
  0xf5   : > { %v1545_v37 = vpop.f32.mrb[0].mxu0  ;;  %v1891_v56 = vpop.f32.mrb[0].mxu1 }
  0xf6   : > { %897 = vst.msk [vmem:[%s1800_s7 + $0x10] sm:$0xff] %vm894_vm3, %v1545_v37  ;;  %v639_v38 = vpop.f32.mrb[1].mxu0  ;;  %v1099_v42 = vmul.f32 %v1545_v37, %v1545_v37  ;;  %v963_v47 = vsel %vm894_vm3, %v1545_v37, 0.0  ;;  %929 = vst.msk [vmem:[%s1800_s7 + $0x110] sm:$0xff] %vm894_vm3, %v1891_v56  ;;  %v1898_v60 = vpop.f32.mrb[1].mxu1 }
  0xf7   : > { %895 = vst.msk [vmem:[%s1800_s7] sm:$0xff] %vm894_vm3, %v639_v38  ;;  %v1097_v39 = vmul.f32 %v639_v38, %v639_v38  ;;  %v1546_v40 = vpop.f32.mrb[2].mxu0  ;;  %v960_v43 = vsel %vm894_vm3, %v639_v38, 0.0  ;;  %927 = vst.msk [vmem:[%s1800_s7 + $0x100] sm:$0xff] %vm894_vm3, %v1898_v60  ;;  %v1907_v1 = vpop.f32.mrb[2].mxu1 }
  0xf8   : > { %898 = vst.msk [vmem:[%s1800_s7 + $0x18] sm:$0xff] %vm894_vm3, %v1546_v40  ;;  %v642_v41 = vpop.f32.mrb[3].mxu0  ;;  %v1100_v49 = vmul.f32 %v1546_v40, %v1546_v40  ;;  %v1164_v53 = vsel %vm894_vm3, %v1099_v42, 0.0  ;;  %v965_v54 = vsel %vm894_vm3, %v1546_v40, 0.0  ;;  %930 = vst.msk [vmem:[%s1800_s7 + $0x118] sm:$0xff] %vm894_vm3, %v1907_v1  ;;  %v1914_v5 = vpop.f32.mrb[3].mxu1 }
  0xf9   : > { %896 = vst.msk [vmem:[%s1800_s7 + $0x8] sm:$0xff] %vm894_vm3, %v642_v41  ;;  %v961_v44 = vsel %vm894_vm3, %v642_v41, 0.0  ;;  %v1098_v45 = vmul.f32 %v642_v41, %v642_v41  ;;  %v1161_v48 = vsel %vm894_vm3, %v1097_v39, 0.0  ;;  %928 = vst.msk [vmem:[%s1800_s7 + $0x108] sm:$0xff] %vm894_vm3, %v1914_v5 }
  0xfa   : > { %v962_v46 = vadd.f32 %v961_v44, %v960_v43  ;;  %v1166_v61 = vsel %vm894_vm3, %v1100_v49, 0.0 }
  0xfb   : > { %v1162_v50 = vsel %vm894_vm3, %v1098_v45, 0.0 }
  0xfc   : > { %v964_v51 = vadd.f32 %v963_v47, %v962_v46  ;;  %v1163_v52 = vadd.f32 %v1162_v50, %v1161_v48 }
  0xfd   : > { %v1549_v55 = vpop.f32.mrb[4].mxu0  ;;  %v1927_v20 = vpop.f32.mrb[4].mxu1 }
  0xfe   : > { %v1165_v57 = vadd.f32 %v1164_v53, %v1163_v52  ;;  %901 = vst.msk [vmem:[%s1800_s7 + $0x30] sm:$0xff] %vm894_vm3, %v1549_v55  ;;  %v655_v58 = vpop.f32.mrb[5].mxu0  ;;  %v966_v59 = vadd.f32 %v965_v54, %v964_v51  ;;  %v1103_v6 = vmul.f32 %v1549_v55, %v1549_v55  ;;  %v971_v12 = vsel %vm894_vm3, %v1549_v55, 0.0  ;;  %933 = vst.msk [vmem:[%s1800_s7 + $0x130] sm:$0xff] %vm894_vm3, %v1927_v20  ;;  %v1934_v24 = vpop.f32.mrb[5].mxu1 }
  0xff   : > { %899 = vst.msk [vmem:[%s1800_s7 + $0x20] sm:$0xff] %vm894_vm3, %v655_v58  ;;  %v967_v62 = vsel %vm894_vm3, %v655_v58, 0.0  ;;  %v1101_v63 = vmul.f32 %v655_v58, %v655_v58  ;;  %v1550_v0 = vpop.f32.mrb[6].mxu0  ;;  %931 = vst.msk [vmem:[%s1800_s7 + $0x120] sm:$0xff] %vm894_vm3, %v1934_v24  ;;  %v1943_v29 = vpop.f32.mrb[6].mxu1 }
 0x100   : > { %v968_v2 = vadd.f32 %v967_v62, %v966_v59  ;;  %v1167_v3 = vadd.f32 %v1166_v61, %v1165_v57  ;;  %902 = vst.msk [vmem:[%s1800_s7 + $0x38] sm:$0xff] %vm894_vm3, %v1550_v0  ;;  %v658_v4 = vpop.f32.mrb[7].mxu0  ;;  %v1104_v13 = vmul.f32 %v1550_v0, %v1550_v0  ;;  %v1172_v17 = vsel %vm894_vm3, %v1103_v6, 0.0  ;;  %934 = vst.msk [vmem:[%s1800_s7 + $0x138] sm:$0xff] %vm894_vm3, %v1943_v29  ;;  %v1950_v33 = vpop.f32.mrb[7].mxu1 }
 0x101   : > { %v1168_v7 = vsel %vm894_vm3, %v1101_v63, 0.0  ;;  %900 = vst.msk [vmem:[%s1800_s7 + $0x28] sm:$0xff] %vm894_vm3, %v658_v4  ;;  %v969_v8 = vsel %vm894_vm3, %v658_v4, 0.0  ;;  %v1102_v9 = vmul.f32 %v658_v4, %v658_v4  ;;  %v973_v18 = vsel %vm894_vm3, %v1550_v0, 0.0  ;;  %932 = vst.msk [vmem:[%s1800_s7 + $0x128] sm:$0xff] %vm894_vm3, %v1950_v33 }
 0x102   : > { %v1169_v10 = vadd.f32 %v1168_v7, %v1167_v3  ;;  %v970_v11 = vadd.f32 %v969_v8, %v968_v2  ;;  %v1174_v25 = vsel %vm894_vm3, %v1104_v13, 0.0 }
 0x103   : > { %v1170_v14 = vsel %vm894_vm3, %v1102_v9, 0.0 }
 0x104   : > { %v972_v15 = vadd.f32 %v971_v12, %v970_v11  ;;  %v1171_v16 = vadd.f32 %v1170_v14, %v1169_v10 }
 0x105   : > { %v1553_v19 = vpop.f32.mrb[8].mxu0  ;;  %v1963_v48 = vpop.f32.mrb[8].mxu1 }
 0x106   : > { %v1173_v21 = vadd.f32 %v1172_v17, %v1171_v16  ;;  %905 = vst.msk [vmem:[%s1800_s7 + $0x50] sm:$0xff] %vm894_vm3, %v1553_v19  ;;  %v671_v22 = vpop.f32.mrb[9].mxu0  ;;  %v974_v23 = vadd.f32 %v973_v18, %v972_v15  ;;  %v1107_v34 = vmul.f32 %v1553_v19, %v1553_v19  ;;  %v979_v40 = vsel %vm894_vm3, %v1553_v19, 0.0  ;;  %937 = vst.msk [vmem:[%s1800_s7 + $0x150] sm:$0xff] %vm894_vm3, %v1963_v48  ;;  %v1970_v52 = vpop.f32.mrb[9].mxu1 }
 0x107   : > { %903 = vst.msk [vmem:[%s1800_s7 + $0x40] sm:$0xff] %vm894_vm3, %v671_v22  ;;  %v975_v26 = vsel %vm894_vm3, %v671_v22, 0.0  ;;  %v1105_v27 = vmul.f32 %v671_v22, %v671_v22  ;;  %v1554_v28 = vpop.f32.mrb[10].mxu0  ;;  %935 = vst.msk [vmem:[%s1800_s7 + $0x140] sm:$0xff] %vm894_vm3, %v1970_v52  ;;  %v1979_v58 = vpop.f32.mrb[10].mxu1 }
 0x108   : > { %v976_v30 = vadd.f32 %v975_v26, %v974_v23  ;;  %v1175_v31 = vadd.f32 %v1174_v25, %v1173_v21  ;;  %906 = vst.msk [vmem:[%s1800_s7 + $0x58] sm:$0xff] %vm894_vm3, %v1554_v28  ;;  %v674_v32 = vpop.f32.mrb[11].mxu0  ;;  %v1108_v41 = vmul.f32 %v1554_v28, %v1554_v28  ;;  %v1180_v45 = vsel %vm894_vm3, %v1107_v34, 0.0  ;;  %938 = vst.msk [vmem:[%s1800_s7 + $0x158] sm:$0xff] %vm894_vm3, %v1979_v58  ;;  %v1986_v63 = vpop.f32.mrb[11].mxu1 }
 0x109   : > { %v1176_v35 = vsel %vm894_vm3, %v1105_v27, 0.0  ;;  %904 = vst.msk [vmem:[%s1800_s7 + $0x48] sm:$0xff] %vm894_vm3, %v674_v32  ;;  %v977_v36 = vsel %vm894_vm3, %v674_v32, 0.0  ;;  %v1106_v37 = vmul.f32 %v674_v32, %v674_v32  ;;  %v981_v46 = vsel %vm894_vm3, %v1554_v28, 0.0  ;;  %936 = vst.msk [vmem:[%s1800_s7 + $0x148] sm:$0xff] %vm894_vm3, %v1986_v63 }
 0x10a   : > { %v1177_v38 = vadd.f32 %v1176_v35, %v1175_v31  ;;  %v978_v39 = vadd.f32 %v977_v36, %v976_v30  ;;  %v1182_v53 = vsel %vm894_vm3, %v1108_v41, 0.0 }
 0x10b   : > { %v1178_v42 = vsel %vm894_vm3, %v1106_v37, 0.0 }
 0x10c   : > { %v980_v43 = vadd.f32 %v979_v40, %v978_v39  ;;  %v1179_v44 = vadd.f32 %v1178_v42, %v1177_v38 }
 0x10d   : > { %v1557_v47 = vpop.f32.mrb[12].mxu0  ;;  %v1999_v16 = vpop.f32.mrb[12].mxu1 }
 0x10e   : > { %v1181_v49 = vadd.f32 %v1180_v45, %v1179_v44  ;;  %909 = vst.msk [vmem:[%s1800_s7 + $0x70] sm:$0xff] %vm894_vm3, %v1557_v47  ;;  %v687_v50 = vpop.f32.mrb[13].mxu0  ;;  %v982_v51 = vadd.f32 %v981_v46, %v980_v43  ;;  %v1111_v0 = vmul.f32 %v1557_v47, %v1557_v47  ;;  %v987_v8 = vsel %vm894_vm3, %v1557_v47, 0.0  ;;  %941 = vst.msk [vmem:[%s1800_s7 + $0x170] sm:$0xff] %vm894_vm3, %v1999_v16  ;;  %v2006_v21 = vpop.f32.mrb[13].mxu1 }
 0x10f   : > { %907 = vst.msk [vmem:[%s1800_s7 + $0x60] sm:$0xff] %vm894_vm3, %v687_v50  ;;  %v983_v54 = vsel %vm894_vm3, %v687_v50, 0.0  ;;  %v1109_v55 = vmul.f32 %v687_v50, %v687_v50  ;;  %v1558_v57 = vpop.f32.mrb[14].mxu0  ;;  %939 = vst.msk [vmem:[%s1800_s7 + $0x160] sm:$0xff] %vm894_vm3, %v2006_v21  ;;  %v2015_v27 = vpop.f32.mrb[14].mxu1 }
 0x110   : > { %v984_v59 = vadd.f32 %v983_v54, %v982_v51  ;;  %v1183_v61 = vadd.f32 %v1182_v53, %v1181_v49  ;;  %910 = vst.msk [vmem:[%s1800_s7 + $0x78] sm:$0xff] %vm894_vm3, %v1558_v57  ;;  %v690_v62 = vpop.f32.mrb[15].mxu0  ;;  %v1112_v9 = vmul.f32 %v1558_v57, %v1558_v57  ;;  %v1188_v13 = vsel %vm894_vm3, %v1111_v0, 0.0  ;;  %942 = vst.msk [vmem:[%s1800_s7 + $0x178] sm:$0xff] %vm894_vm3, %v2015_v27  ;;  %v2022_v32 = vpop.f32.mrb[15].mxu1 }
 0x111   : > { %v1184_v2 = vsel %vm894_vm3, %v1109_v55, 0.0  ;;  %908 = vst.msk [vmem:[%s1800_s7 + $0x68] sm:$0xff] %vm894_vm3, %v690_v62  ;;  %v985_v3 = vsel %vm894_vm3, %v690_v62, 0.0  ;;  %v1110_v4 = vmul.f32 %v690_v62, %v690_v62  ;;  %v989_v14 = vsel %vm894_vm3, %v1558_v57, 0.0  ;;  %940 = vst.msk [vmem:[%s1800_s7 + $0x168] sm:$0xff] %vm894_vm3, %v2022_v32 }
 0x112   : > { %v1185_v6 = vadd.f32 %v1184_v2, %v1183_v61  ;;  %v986_v7 = vadd.f32 %v985_v3, %v984_v59  ;;  %v1190_v22 = vsel %vm894_vm3, %v1112_v9, 0.0 }
 0x113   : > { %v1186_v10 = vsel %vm894_vm3, %v1110_v4, 0.0 }
 0x114   : > { %v988_v11 = vadd.f32 %v987_v8, %v986_v7  ;;  %v1187_v12 = vadd.f32 %v1186_v10, %v1185_v6 }
 0x115   : > { %v1561_v15 = vpop.f32.mrb[16].mxu0  ;;  %v2035_v49 = vpop.f32.mrb[16].mxu1 }
 0x116   : > { %v1189_v17 = vadd.f32 %v1188_v13, %v1187_v12  ;;  %913 = vst.msk [vmem:[%s1800_s7 + $0x90] sm:$0xff] %vm894_vm3, %v1561_v15  ;;  %v703_v18 = vpop.f32.mrb[17].mxu0  ;;  %v990_v19 = vadd.f32 %v989_v14, %v988_v11  ;;  %v1115_v34 = vmul.f32 %v1561_v15, %v1561_v15  ;;  %v995_v40 = vsel %vm894_vm3, %v1561_v15, 0.0  ;;  %945 = vst.msk [vmem:[%s1800_s7 + $0x190] sm:$0xff] %vm894_vm3, %v2035_v49  ;;  %v2042_v54 = vpop.f32.mrb[17].mxu1 }
 0x117   : > { %911 = vst.msk [vmem:[%s1800_s7 + $0x80] sm:$0xff] %vm894_vm3, %v703_v18  ;;  %v991_v23 = vsel %vm894_vm3, %v703_v18, 0.0  ;;  %v1113_v25 = vmul.f32 %v703_v18, %v703_v18  ;;  %v1562_v26 = vpop.f32.mrb[18].mxu0  ;;  %943 = vst.msk [vmem:[%s1800_s7 + $0x180] sm:$0xff] %vm894_vm3, %v2042_v54  ;;  %v2051_v62 = vpop.f32.mrb[18].mxu1 }
 0x118   : > { %v992_v28 = vadd.f32 %v991_v23, %v990_v19  ;;  %v1191_v30 = vadd.f32 %v1190_v22, %v1189_v17  ;;  %914 = vst.msk [vmem:[%s1800_s7 + $0x98] sm:$0xff] %vm894_vm3, %v1562_v26  ;;  %v706_v31 = vpop.f32.mrb[19].mxu0  ;;  %v1116_v41 = vmul.f32 %v1562_v26, %v1562_v26  ;;  %v1196_v45 = vsel %vm894_vm3, %v1115_v34, 0.0  ;;  %946 = vst.msk [vmem:[%s1800_s7 + $0x198] sm:$0xff] %vm894_vm3, %v2051_v62  ;;  %v2058_v4 = vpop.f32.mrb[19].mxu1 }
 0x119   : > { %v1192_v35 = vsel %vm894_vm3, %v1113_v25, 0.0  ;;  %912 = vst.msk [vmem:[%s1800_s7 + $0x88] sm:$0xff] %vm894_vm3, %v706_v31  ;;  %v993_v36 = vsel %vm894_vm3, %v706_v31, 0.0  ;;  %v1114_v37 = vmul.f32 %v706_v31, %v706_v31  ;;  %v997_v46 = vsel %vm894_vm3, %v1562_v26, 0.0  ;;  %944 = vst.msk [vmem:[%s1800_s7 + $0x188] sm:$0xff] %vm894_vm3, %v2058_v4 }
 0x11a   : > { %v1193_v38 = vadd.f32 %v1192_v35, %v1191_v30  ;;  %v994_v39 = vadd.f32 %v993_v36, %v992_v28  ;;  %v1198_v55 = vsel %vm894_vm3, %v1116_v41, 0.0 }
 0x11b   : > { %v1194_v42 = vsel %vm894_vm3, %v1114_v37, 0.0 }
 0x11c   : > { %v996_v43 = vadd.f32 %v995_v40, %v994_v39  ;;  %v1195_v44 = vadd.f32 %v1194_v42, %v1193_v38 }
 0x11d   : > { %v1565_v47 = vpop.f32.mrb[20].mxu0  ;;  %v2071_v23 = vpop.f32.mrb[20].mxu1 }
 0x11e   : > { %v1197_v50 = vadd.f32 %v1196_v45, %v1195_v44  ;;  %917 = vst.msk [vmem:[%s1800_s7 + $0xb0] sm:$0xff] %vm894_vm3, %v1565_v47  ;;  %v719_v51 = vpop.f32.mrb[21].mxu0  ;;  %v998_v53 = vadd.f32 %v997_v46, %v996_v43  ;;  %v1119_v6 = vmul.f32 %v1565_v47, %v1565_v47  ;;  %v1003_v12 = vsel %vm894_vm3, %v1565_v47, 0.0  ;;  %949 = vst.msk [vmem:[%s1800_s7 + $0x1b0] sm:$0xff] %vm894_vm3, %v2071_v23  ;;  %v2078_v30 = vpop.f32.mrb[21].mxu1 }
 0x11f   : > { %915 = vst.msk [vmem:[%s1800_s7 + $0xa0] sm:$0xff] %vm894_vm3, %v719_v51  ;;  %v999_v57 = vsel %vm894_vm3, %v719_v51, 0.0  ;;  %v1117_v59 = vmul.f32 %v719_v51, %v719_v51  ;;  %v1566_v61 = vpop.f32.mrb[22].mxu0  ;;  %947 = vst.msk [vmem:[%s1800_s7 + $0x1a0] sm:$0xff] %vm894_vm3, %v2078_v30  ;;  %v2087_v37 = vpop.f32.mrb[22].mxu1 }
 0x120   : > { %v1000_v0 = vadd.f32 %v999_v57, %v998_v53  ;;  %v1199_v2 = vadd.f32 %v1198_v55, %v1197_v50  ;;  %918 = vst.msk [vmem:[%s1800_s7 + $0xb8] sm:$0xff] %vm894_vm3, %v1566_v61  ;;  %v722_v3 = vpop.f32.mrb[23].mxu0  ;;  %v1120_v13 = vmul.f32 %v1566_v61, %v1566_v61  ;;  %v1204_v18 = vsel %vm894_vm3, %v1119_v6, 0.0  ;;  %950 = vst.msk [vmem:[%s1800_s7 + $0x1b8] sm:$0xff] %vm894_vm3, %v2087_v37  ;;  %v2094_v41 = vpop.f32.mrb[23].mxu1 }
 0x121   : > { %v1200_v7 = vsel %vm894_vm3, %v1117_v59, 0.0  ;;  %916 = vst.msk [vmem:[%s1800_s7 + $0xa8] sm:$0xff] %vm894_vm3, %v722_v3  ;;  %v1001_v8 = vsel %vm894_vm3, %v722_v3, 0.0  ;;  %v1118_v9 = vmul.f32 %v722_v3, %v722_v3  ;;  %v1005_v19 = vsel %vm894_vm3, %v1566_v61, 0.0  ;;  %948 = vst.msk [vmem:[%s1800_s7 + $0x1a8] sm:$0xff] %vm894_vm3, %v2094_v41 }
 0x122   : > { %v1201_v10 = vadd.f32 %v1200_v7, %v1199_v2  ;;  %v1002_v11 = vadd.f32 %v1001_v8, %v1000_v0  ;;  %v1206_v31 = vsel %vm894_vm3, %v1120_v13, 0.0 }
 0x123   : > { %v1202_v14 = vsel %vm894_vm3, %v1118_v9, 0.0 }
 0x124   : > { %v1004_v15 = vadd.f32 %v1003_v12, %v1002_v11  ;;  %v1203_v17 = vadd.f32 %v1202_v14, %v1201_v10 }
 0x125   : > { %v1569_v22 = vpop.f32.mrb[24].mxu0  ;;  %v2107_v2 = vpop.f32.mrb[24].mxu1 }
 0x126   : > { %v1205_v25 = vadd.f32 %v1204_v18, %v1203_v17  ;;  %921 = vst.msk [vmem:[%s1800_s7 + $0xd0] sm:$0xff] %vm894_vm3, %v1569_v22  ;;  %v735_v26 = vpop.f32.mrb[25].mxu0  ;;  %v1006_v28 = vadd.f32 %v1005_v19, %v1004_v15  ;;  %v1123_v42 = vmul.f32 %v1569_v22, %v1569_v22  ;;  %v1011_v50 = vsel %vm894_vm3, %v1569_v22, 0.0  ;;  %953 = vst.msk [vmem:[%s1800_s7 + $0x1d0] sm:$0xff] %vm894_vm3, %v2107_v2  ;;  %v2114_v8 = vpop.f32.mrb[25].mxu1 }
 0x127   : > { %919 = vst.msk [vmem:[%s1800_s7 + $0xc0] sm:$0xff] %vm894_vm3, %v735_v26  ;;  %v1007_v34 = vsel %vm894_vm3, %v735_v26, 0.0  ;;  %v1121_v35 = vmul.f32 %v735_v26, %v735_v26  ;;  %v1570_v36 = vpop.f32.mrb[26].mxu0  ;;  %951 = vst.msk [vmem:[%s1800_s7 + $0x1c0] sm:$0xff] %vm894_vm3, %v2114_v8  ;;  %v2123_v13 = vpop.f32.mrb[26].mxu1 }
 0x128   : > { %v1008_v38 = vadd.f32 %v1007_v34, %v1006_v28  ;;  %v1207_v39 = vadd.f32 %v1206_v31, %v1205_v25  ;;  %922 = vst.msk [vmem:[%s1800_s7 + $0xd8] sm:$0xff] %vm894_vm3, %v1570_v36  ;;  %v738_v40 = vpop.f32.mrb[27].mxu0  ;;  %v1124_v51 = vmul.f32 %v1570_v36, %v1570_v36  ;;  %v1212_v59 = vsel %vm894_vm3, %v1123_v42, 0.0  ;;  %954 = vst.msk [vmem:[%s1800_s7 + $0x1d8] sm:$0xff] %vm894_vm3, %v2123_v13  ;;  %v2130_v18 = vpop.f32.mrb[27].mxu1 }
 0x129   : > { %v1208_v43 = vsel %vm894_vm3, %v1121_v35, 0.0  ;;  %920 = vst.msk [vmem:[%s1800_s7 + $0xc8] sm:$0xff] %vm894_vm3, %v738_v40  ;;  %v1009_v44 = vsel %vm894_vm3, %v738_v40, 0.0  ;;  %v1122_v45 = vmul.f32 %v738_v40, %v738_v40  ;;  %v1013_v61 = vsel %vm894_vm3, %v1570_v36, 0.0  ;;  %952 = vst.msk [vmem:[%s1800_s7 + $0x1c8] sm:$0xff] %vm894_vm3, %v2130_v18 }
 0x12a   : > { %v1209_v46 = vadd.f32 %v1208_v43, %v1207_v39  ;;  %v1010_v47 = vadd.f32 %v1009_v44, %v1008_v38  ;;  %v1214_v9 = vsel %vm894_vm3, %v1124_v51, 0.0  ;;  %v1129_v38 = vmul.f32 %v1898_v60, %v1898_v60 }
 0x12b   : > { %v1210_v53 = vsel %vm894_vm3, %v1122_v45, 0.0  ;;  %v1023_v44 = vsel %vm894_vm3, %v1898_v60, 0.0 }
 0x12c   : > { %v1012_v55 = vadd.f32 %v1011_v50, %v1010_v47  ;;  %v1211_v57 = vadd.f32 %v1210_v53, %v1209_v46  ;;  %v1224_v53 = vsel %vm894_vm3, %v1129_v38, 0.0 }
 0x12d   : > { %v1573_v0 = vpop.f32.mrb[28].mxu0  ;;  %v2147_v45 = vpop.f32.mrb[28].mxu1 }
 0x12e   : > { %v1213_v3 = vadd.f32 %v1212_v59, %v1211_v57  ;;  %925 = vst.msk [vmem:[%s1800_s7 + $0xf0] sm:$0xff] %vm894_vm3, %v1573_v0  ;;  %v751_v6 = vpop.f32.mrb[29].mxu0  ;;  %v1014_v7 = vadd.f32 %v1013_v61, %v1012_v55  ;;  %v1127_v19 = vmul.f32 %v1573_v0, %v1573_v0  ;;  %v1019_v34 = vsel %vm894_vm3, %v1573_v0, 0.0  ;;  %957 = vst.msk [vmem:[%s1800_s7 + $0x1f0] sm:$0xff] %vm894_vm3, %v2147_v45  ;;  %v2152_v50 = vpop.f32.mrb[29].mxu1 }
 0x12f   : > { %923 = vst.msk [vmem:[%s1800_s7 + $0xe0] sm:$0xff] %vm894_vm3, %v751_v6  ;;  %v1015_v10 = vsel %vm894_vm3, %v751_v6, 0.0  ;;  %v1125_v11 = vmul.f32 %v751_v6, %v751_v6  ;;  %v1574_v12 = vpop.f32.mrb[30].mxu0  ;;  %v1130_v55 = vmul.f32 %v1914_v5, %v1914_v5  ;;  %955 = vst.msk [vmem:[%s1800_s7 + $0x1e0] sm:$0xff] %vm894_vm3, %v2152_v50  ;;  %v2161_v60 = vpop.f32.mrb[30].mxu1  ;;  %v1131_v0 = vmul.f32 %v1891_v56, %v1891_v56 }
 0x130   : > { %v1016_v14 = vadd.f32 %v1015_v10, %v1014_v7  ;;  %v1215_v15 = vadd.f32 %v1214_v9, %v1213_v3  ;;  %926 = vst.msk [vmem:[%s1800_s7 + $0xf8] sm:$0xff] %vm894_vm3, %v1574_v12  ;;  %v754_v17 = vpop.f32.mrb[31].mxu0  ;;  %v1128_v35 = vmul.f32 %v1574_v12, %v1574_v12  ;;  %v1220_v42 = vsel %vm894_vm3, %v1127_v19, 0.0  ;;  %958 = vst.msk [vmem:[%s1800_s7 + $0x1f8] sm:$0xff] %vm894_vm3, %v2161_v60  ;;  %v2166_v61 = vpop.f32.mrb[31].mxu1 }
 0x131   : > { %v1216_v22 = vsel %vm894_vm3, %v1125_v11, 0.0  ;;  %924 = vst.msk [vmem:[%s1800_s7 + $0xe8] sm:$0xff] %vm894_vm3, %v754_v17  ;;  %v1017_v25 = vsel %vm894_vm3, %v754_v17, 0.0  ;;  %v1126_v26 = vmul.f32 %v754_v17, %v754_v17  ;;  %v1021_v43 = vsel %vm894_vm3, %v1574_v12, 0.0  ;;  %956 = vst.msk [vmem:[%s1800_s7 + $0x1e8] sm:$0xff] %vm894_vm3, %v2166_v61 }
 0x132   : > { %v1217_v28 = vadd.f32 %v1216_v22, %v1215_v15  ;;  %v1018_v31 = vadd.f32 %v1017_v25, %v1016_v14  ;;  %v1222_v51 = vsel %vm894_vm3, %v1128_v35, 0.0  ;;  %v1025_v3 = vsel %vm894_vm3, %v1914_v5, 0.0 }
 0x133   : > { %v1218_v36 = vsel %vm894_vm3, %v1126_v26, 0.0  ;;  %v1027_v9 = vsel %vm894_vm3, %v1891_v56, 0.0  ;;  %v1132_v10 = vmul.f32 %v1907_v1, %v1907_v1  ;;  %v1226_v11 = vsel %vm894_vm3, %v1130_v55, 0.0 }
 0x134   : > { %v1020_v39 = vadd.f32 %v1019_v34, %v1018_v31  ;;  %v1219_v40 = vadd.f32 %v1218_v36, %v1217_v28  ;;  %v1133_v12 = vmul.f32 %v1934_v24, %v1934_v24  ;;  %v1228_v5 = vsel %vm894_vm3, %v1131_v0, 0.0 }
 0x135   : > { %v1029_v17 = vsel %vm894_vm3, %v1907_v1, 0.0  ;;  %v1031_v19 = vsel %vm894_vm3, %v1934_v24, 0.0  ;;  %v1230_v25 = vsel %vm894_vm3, %v1132_v10, 0.0  ;;  %v1134_v28 = vmul.f32 %v1950_v33, %v1950_v33 }
 0x136   : > { %v1221_v46 = vadd.f32 %v1220_v42, %v1219_v40  ;;  %v1022_v47 = vadd.f32 %v1021_v43, %v1020_v39  ;;  %v1232_v26 = vsel %vm894_vm3, %v1133_v12, 0.0  ;;  %v1135_v35 = vmul.f32 %v1927_v20, %v1927_v20 }
 0x137   : > { %v1033_v1 = vsel %vm894_vm3, %v1950_v33, 0.0  ;;  %v1035_v24 = vsel %vm894_vm3, %v1927_v20, 0.0  ;;  %v1136_v39 = vmul.f32 %v1943_v29, %v1943_v29  ;;  %v1234_v40 = vsel %vm894_vm3, %v1134_v28, 0.0 }
 0x138   : > { %v1024_v57 = vadd.f32 %v1023_v44, %v1022_v47  ;;  %v1223_v59 = vadd.f32 %v1222_v51, %v1221_v46  ;;  %v1137_v42 = vmul.f32 %v1970_v52, %v1970_v52  ;;  %v1236_v46 = vsel %vm894_vm3, %v1135_v35, 0.0 }
 0x139   : > { %v1037_v33 = vsel %vm894_vm3, %v1943_v29, 0.0  ;;  %v1039_v47 = vsel %vm894_vm3, %v1970_v52, 0.0  ;;  %v1041_v29 = vsel %vm894_vm3, %v1986_v63, 0.0  ;;  %v1043_v52 = vsel %vm894_vm3, %v1963_v48, 0.0 }
 0x13a   : > { %v1225_v6 = vadd.f32 %v1224_v53, %v1223_v59  ;;  %v1026_v7 = vadd.f32 %v1025_v3, %v1024_v57  ;;  %v1238_v53 = vsel %vm894_vm3, %v1136_v39, 0.0  ;;  %v1240_v55 = vsel %vm894_vm3, %v1137_v42, 0.0 }
 0x13b   : > { %v1138_v57 = vmul.f32 %v1986_v63, %v1986_v63  ;;  %v1139_v3 = vmul.f32 %v1963_v48, %v1963_v48  ;;  %v1045_v63 = vsel %vm894_vm3, %v1979_v58, 0.0  ;;  %v1143_v28 = vmul.f32 %v1999_v16, %v1999_v16 }
 0x13c   : > { %v1028_v14 = vadd.f32 %v1027_v9, %v1026_v7  ;;  %v1227_v15 = vadd.f32 %v1226_v11, %v1225_v6  ;;  %v1140_v9 = vmul.f32 %v1979_v58, %v1979_v58  ;;  %v1141_v11 = vmul.f32 %v2006_v21, %v2006_v21 }
 0x13d   : > { %v1242_v10 = vsel %vm894_vm3, %v1138_v57, 0.0  ;;  %v1049_v58 = vsel %vm894_vm3, %v2022_v32, 0.0  ;;  %v1144_v35 = vmul.f32 %v2015_v27, %v2015_v27  ;;  %v1252_v39 = vsel %vm894_vm3, %v1143_v28, 0.0 }
 0x13e   : > { %v1229_v22 = vadd.f32 %v1228_v5, %v1227_v15  ;;  %v1030_v56 = vadd.f32 %v1029_v17, %v1028_v14  ;;  %v1244_v15 = vsel %vm894_vm3, %v1139_v3, 0.0  ;;  %v1047_v5 = vsel %vm894_vm3, %v2006_v21, 0.0 }
 0x13f   : > { %v1051_v21 = vsel %vm894_vm3, %v1999_v16, 0.0 }
 0x140   : > { %v1032_v31 = vadd.f32 %v1031_v19, %v1030_v56  ;;  %v1231_v34 = vadd.f32 %v1230_v25, %v1229_v22  ;;  %v1246_v19 = vsel %vm894_vm3, %v1140_v9, 0.0  ;;  %v1248_v22 = vsel %vm894_vm3, %v1141_v11, 0.0 }
 0x141   : > { %v1142_v56 = vmul.f32 %v2022_v32, %v2022_v32  ;;  %v1053_v32 = vsel %vm894_vm3, %v2015_v27, 0.0  ;;  %v1057_v27 = vsel %vm894_vm3, %v2058_v4, 0.0 }
 0x142   : > { %v1233_v36 = vadd.f32 %v1232_v26, %v1231_v34  ;;  %v1034_v38 = vadd.f32 %v1033_v1, %v1032_v31 }
 0x143   : > { %v1250_v1 = vsel %vm894_vm3, %v1142_v56, 0.0 }
 0x144   : > { %v1036_v43 = vadd.f32 %v1035_v24, %v1034_v38  ;;  %v1235_v44 = vadd.f32 %v1234_v40, %v1233_v36  ;;  %v1145_v36 = vmul.f32 %v2042_v54, %v2042_v54  ;;  %v1055_v40 = vsel %vm894_vm3, %v2042_v54, 0.0 }
 0x145   : > { %v1059_v54 = vsel %vm894_vm3, %v2035_v49, 0.0 }
 0x146   : > { %v1237_v51 = vadd.f32 %v1236_v46, %v1235_v44  ;;  %v1038_v20 = vadd.f32 %v1037_v33, %v1036_v43  ;;  %v1254_v43 = vsel %vm894_vm3, %v1144_v35, 0.0  ;;  %v1256_v44 = vsel %vm894_vm3, %v1145_v36, 0.0 }
 0x147   : > { %v1146_v46 = vmul.f32 %v2058_v4, %v2058_v4  ;;  %v1061_v4 = vsel %vm894_vm3, %v2051_v62, 0.0  ;;  %v1155_v35 = vmul.f32 %v2107_v2, %v2107_v2 }
 0x148   : > { %v1040_v59 = vadd.f32 %v1039_v47, %v1038_v20  ;;  %v1239_v0 = vadd.f32 %v1238_v53, %v1237_v51  ;;  %v1147_v51 = vmul.f32 %v2035_v49, %v2035_v49 }
 0x149   : > { %v1258_v57 = vsel %vm894_vm3, %v1146_v46, 0.0 }
 0x14a   : > { %v1241_v6 = vadd.f32 %v1240_v55, %v1239_v0  ;;  %v1042_v7 = vadd.f32 %v1041_v29, %v1040_v59  ;;  %v1148_v55 = vmul.f32 %v2051_v62, %v2051_v62  ;;  %v1149_v59 = vmul.f32 %v2078_v30, %v2078_v30 }
 0x14b   : > { %v1260_v29 = vsel %vm894_vm3, %v1147_v51, 0.0  ;;  %v1065_v62 = vsel %vm894_vm3, %v2094_v41, 0.0 }
 0x14c   : > { %v1044_v12 = vadd.f32 %v1043_v52, %v1042_v7  ;;  %v1243_v14 = vadd.f32 %v1242_v10, %v1241_v6  ;;  %v1063_v6 = vsel %vm894_vm3, %v2078_v30, 0.0  ;;  %v1262_v52 = vsel %vm894_vm3, %v1148_v55, 0.0 }
 0x14d   : > { %v1264_v9 = vsel %vm894_vm3, %v1149_v59, 0.0  ;;  %v1150_v10 = vmul.f32 %v2094_v41, %v2094_v41  ;;  %v1067_v30 = vsel %vm894_vm3, %v2071_v23, 0.0  ;;  %v1069_v41 = vsel %vm894_vm3, %v2087_v37, 0.0 }
 0x14e   : > { %v1245_v17 = vadd.f32 %v1244_v15, %v1243_v14  ;;  %v1046_v48 = vadd.f32 %v1045_v63, %v1044_v12  ;;  %v1151_v14 = vmul.f32 %v2071_v23, %v2071_v23 }
 0x150   : > { %v1048_v25 = vadd.f32 %v1047_v5, %v1046_v48  ;;  %v1247_v26 = vadd.f32 %v1246_v19, %v1245_v17  ;;  %v1152_v5 = vmul.f32 %v2087_v37, %v2087_v37  ;;  %v1266_v17 = vsel %vm894_vm3, %v1150_v10, 0.0 }
 0x151   : > { %v1153_v48 = vmul.f32 %v2114_v8, %v2114_v8  ;;  %v1268_v56 = vsel %vm894_vm3, %v1151_v14, 0.0  ;;  %v1073_v37 = vsel %vm894_vm3, %v2130_v18, 0.0 }
 0x152   : > { %v1249_v31 = vadd.f32 %v1248_v22, %v1247_v26  ;;  %v1050_v34 = vadd.f32 %v1049_v58, %v1048_v25  ;;  %v1071_v25 = vsel %vm894_vm3, %v2114_v8, 0.0  ;;  %v1270_v28 = vsel %vm894_vm3, %v1152_v5, 0.0 }
 0x153   : > { %v1272_v58 = vsel %vm894_vm3, %v1153_v48, 0.0  ;;  %v1075_v8 = vsel %vm894_vm3, %v2107_v2, 0.0 }
 0x154   : > { %v1052_v38 = vadd.f32 %v1051_v21, %v1050_v34  ;;  %v1251_v24 = vadd.f32 %v1250_v1, %v1249_v31  ;;  %v1154_v31 = vmul.f32 %v2130_v18, %v2130_v18  ;;  %v1077_v18 = vsel %vm894_vm3, %v2123_v13, 0.0 }
 0x156   : > { %v1253_v42 = vadd.f32 %v1252_v39, %v1251_v24  ;;  %v1054_v16 = vadd.f32 %v1053_v32, %v1052_v38  ;;  %v1156_v38 = vmul.f32 %v2123_v13, %v2123_v13  ;;  %v1274_v24 = vsel %vm894_vm3, %v1154_v31, 0.0 }
 0x157   : > { %v1157_v39 = vmul.f32 %v2152_v50, %v2152_v50  ;;  %v1081_v13 = vsel %vm894_vm3, %v2166_v61, 0.0 }
 0x158   : > { %v1056_v33 = vadd.f32 %v1055_v40, %v1054_v16  ;;  %v1255_v47 = vadd.f32 %v1254_v43, %v1253_v42  ;;  %v1276_v42 = vsel %vm894_vm3, %v1155_v35, 0.0  ;;  %v1079_v16 = vsel %vm894_vm3, %v2152_v50, 0.0 }
 0x159   : > { %v1280_v46 = vsel %vm894_vm3, %v1157_v39, 0.0  ;;  %v1083_v50 = vsel %vm894_vm3, %v2147_v45, 0.0 }
 0x15a   : > { %v1257_v20 = vadd.f32 %v1256_v44, %v1255_v47  ;;  %v1058_v53 = vadd.f32 %v1057_v27, %v1056_v33  ;;  %v1278_v44 = vsel %vm894_vm3, %v1156_v38, 0.0  ;;  %v1158_v33 = vmul.f32 %v2166_v61, %v2166_v61 }
 0x15b   : > { %v1159_v27 = vmul.f32 %v2147_v45, %v2147_v45 }
 0x15c   : > { %v1060_v0 = vadd.f32 %v1059_v54, %v1058_v53  ;;  %v1259_v3 = vadd.f32 %v1258_v57, %v1257_v20  ;;  %v1160_v54 = vmul.f32 %v2161_v60, %v2161_v60  ;;  %v1282_v55 = vsel %vm894_vm3, %v1158_v33, 0.0 }
 0x15e   : > { %v1261_v7 = vadd.f32 %v1260_v29, %v1259_v3  ;;  %v1062_v49 = vadd.f32 %v1061_v4, %v1060_v0  ;;  %v1284_v0 = vsel %vm894_vm3, %v1159_v27, 0.0  ;;  %v1085_v3 = vsel %vm894_vm3, %v2161_v60, 0.0 }
 0x15f   : > { %v1286_v61 = vsel %vm894_vm3, %v1160_v54, 0.0 }
 0x160   : > { %v1064_v11 = vadd.f32 %v1063_v6, %v1062_v49  ;;  %v1263_v12 = vadd.f32 %v1262_v52, %v1261_v7 }
 0x162   : > { %v1265_v15 = vadd.f32 %v1264_v9, %v1263_v12  ;;  %v1066_v63 = vadd.f32 %v1065_v62, %v1064_v11  ;;  %v959_v62 = vld [vmem:[#allocation2] sm:$0x1] }
 0x164   : > { %v1068_v19 = vadd.f32 %v1067_v30, %v1066_v63  ;;  %v1267_v22 = vadd.f32 %v1266_v17, %v1265_v15  ;;  %v1096_v30 = vld [vmem:[#allocation3] sm:$0x1] }
 0x166   : > { %v1269_v26 = vadd.f32 %v1268_v56, %v1267_v22  ;;  %v1070_v23 = vadd.f32 %v1069_v41, %v1068_v19 }
 0x168   : > { %v1072_v34 = vadd.f32 %v1071_v25, %v1070_v23  ;;  %v1271_v21 = vadd.f32 %v1270_v28, %v1269_v26  ;;  %v1307_v28 = vld [vmem:[%s2385_s2] sm:$0x1] (!%p1495_p5) }
 0x16a   : > { %v1273_v1 = vadd.f32 %v1272_v58, %v1271_v21  ;;  %v1074_v36 = vadd.f32 %v1073_v37, %v1072_v34  ;;  %v1312_v34 = vld [vmem:[%s2386_s3] sm:$0x1] (!%p1495_p5) }
 0x16c   : > { %v1076_v32 = vadd.f32 %v1075_v8, %v1074_v36  ;;  %v1275_v40 = vadd.f32 %v1274_v24, %v1273_v1 }
 0x16e   : > { %v1277_v43 = vadd.f32 %v1276_v42, %v1275_v40  ;;  %v1078_v2 = vadd.f32 %v1077_v18, %v1076_v32 }
 0x170   : > { %v1080_v47 = vadd.f32 %v1079_v16, %v1078_v2  ;;  %v1279_v51 = vadd.f32 %v1278_v44, %v1277_v43 }
 0x172   : > { %v1281_v20 = vadd.f32 %v1280_v46, %v1279_v51  ;;  %v1082_v53 = vadd.f32 %v1081_v13, %v1080_v47 }
 0x174   : > { %v1084_v57 = vadd.f32 %v1083_v50, %v1082_v53  ;;  %v1283_v59 = vadd.f32 %v1282_v55, %v1281_v20 }
 0x176   : > { %v1086_v29 = vadd.f32 %v1085_v3, %v1084_v57  ;;  %v1285_v4 = vadd.f32 %v1284_v0, %v1283_v59 }
 0x178   : > { %v1087_v6 = vrot.slane %v1086_v29, 4  ;;  %v1287_v7 = vadd.f32 %v1286_v61, %v1285_v4 }
 0x17a   : > { %v1088_v49 = vadd.f32 %v1087_v6, %v1086_v29  ;;  %v1288_v45 = vrot.slane %v1287_v7, 4 }
 0x17c   : > { %v1089_v52 = vrot.slane %v1088_v49, 2  ;;  %v1289_v9 = vadd.f32 %v1288_v45, %v1287_v7 }
 0x17e   : > { %v1090_v10 = vadd.f32 %v1089_v52, %v1088_v49  ;;  %v1290_v11 = vrot.slane %v1289_v9, 2 }
 0x180   : > { %v1091_v12 = vrot.slane %v1090_v10, 1  ;;  %v1291_v14 = vadd.f32 %v1290_v11, %v1289_v9 }
 0x182   : > { %v1092_v15 = vadd.f32 %v1091_v12, %v1090_v10  ;;  %v1292_v63 = vrot.slane %v1291_v14, 1  ;;  %1299 = sbr.rel (%p1495_p5) target bundleno = 426 (0x1aa), region = 44 }
 0x184   : > { %v1093_v60 = vadd.f32 %v1092_v15, %v959_v62  ;;  %v1293_v5 = vadd.f32 %v1292_v63, %v1291_v14 }
 0x186   : > { %1095 = vst.msk [vmem:[#allocation2] sm:$0x1] %vm1094_vm4, %v1093_v60  ;;  %v1294_v17 = vadd.f32 %v1293_v5, %v1096_v30 }
 0x188   : > { %1295 = vst.msk [vmem:[#allocation3] sm:$0x1] %vm1094_vm4, %v1294_v17 }
 0x18d   : > { %v1300_v48 = vld [vmem:[#allocation2] sm:$0x1] }
 0x18e   : > { %v1301_v22 = vmul.f32 0.00048828125, %v1300_v48 }
 0x18f   : > { %v1302_v19 = vld [vmem:[#allocation3] sm:$0x1] }
 0x190   : > { %v1303_v56 = vmul.f32 0.00048828125, %v1302_v19  ;;  %v1304_v41 = vmul.f32 %v1301_v22, %v1301_v22 }
 0x192   : > { %v1305_v25 = vsub.f32 %v1303_v56, %v1304_v41 }
 0x194   : > { %v1306_v26 = vmax.f32 %v1305_v25, 0.0 }
 0x196   : > { %v1308_v23 = vadd.f32 1e-05, %v1306_v26 }
 0x198   : > { %1673 = vrsqrt.f32 %v1308_v23 }
 0x1a2   : > { %v1674_v58 = vpop.eup %1673 }
 0x1a3   : > { %v1310_v31 = vmul.f32 %v1674_v58, %v1307_v28 }
 0x1a5   : > { %1311 = vst.msk [vmem:[#allocation4] sm:$0x1] %vm1094_vm4, %v1310_v31  ;;  %v1313_v21 = vmul.f32 %v1310_v31, %v1301_v22 }
 0x1a7   : > { %v1314_v35 = vsub.f32 %v1312_v34, %v1313_v21 }
 0x1a9   : > { %1315 = vst.msk [vmem:[#allocation6] sm:$0x1] %vm1094_vm4, %v1314_v35 }
 0x1aa PF: > { %p1623_p6 = scmp.eq.s32.totalorder %s1787_s22, 3  ;;  %s1744_s18 = smov [#allocation4]  }
 0x1ab   : > { %s1332_s19 = sshll.u32 %s1744_s18, 4  ;;  %s1745_s20 = smov [#allocation6]   ;;  %s1333_s19 = int_to_ptr.vmem [resolvable:$true] %s1332_s19 }
 0x1ac   : > { %s1343_s23 = sshll.u32 %s1745_s20, 4  ;;  %s1675_s24 = scalar_lea.vmem %s1333_s19, 16  ;;  %s1344_s23 = int_to_ptr.vmem [resolvable:$true] %s1343_s23 }
 0x1ad   : > { %p1676_p7 = scmp.ne.s32.totalorder %s1333_s19, %s1675_s24  ;;  %s1681_s25 = scalar_lea.vmem %s1333_s19, 32 }
 0x1ae   : > { %p1682_p10 = scmp.lt.s32.totalorder %s1333_s19, %s1333_s19  ;;  %p1683_p11 = scmp.lt.s32.totalorder %s1681_s25, %s1675_s24 }
 0x1af   : > { %p1677_p8 = pnand %p1676_p7, %p1623_p6 }
 0x1b0   : > { %p1684_p12 = por %p1683_p11, %p1682_p10 }
 0x1b1   : > { %p1678_p9 = pneg %p1677_p8 }
 0x1b3   : > { %p1685_p13 = pnand %p1684_p12, %p1678_p9 }
 0x1b5   : > { %1688 = shalt.err (!%p1685_p13)
}
 0x1b6   : > { %s1689_s28 = scalar_lea.hbm %s2388_s5, 16 }
 0x1b7   : > { %p1690_p0 = scmp.ne.s32.totalorder %s2388_s5, %s1689_s28  ;;  %p1695_p3 = scmp.lt.u32.totalorder %s1689_s28, %s2388_s5 }
 0x1b9   : > { %p1691_p1 = pnand %p1690_p0, %p1623_p6 }
 0x1bb   : > { %p1692_p2 = pneg %p1691_p1 }
 0x1bd   : > { %p1697_p4 = pnand %p1695_p3, %p1692_p2 }
 0x1bf   : > { %1700 = shalt.err (!%p1697_p4)
}
 0x1c0   : > { %1616 = dma.vmem_to_hbm [thread:$0]  (%p1623_p6), %s1333_s19, 16, %s2388_s5, [#allocation5]  }
 0x1c1   : > { %s1701_s11 = scalar_lea.vmem %s1344_s23, 16  ;;  %s1707_s12 = scalar_lea.vmem %s1344_s23, 32 }
 0x1c2   : > { %p1702_p5 = scmp.ne.s32.totalorder %s1344_s23, %s1701_s11  ;;  %p1708_p9 = scmp.lt.s32.totalorder %s1344_s23, %s1344_s23 }
 0x1c3   : > { %p1709_p10 = scmp.lt.s32.totalorder %s1707_s12, %s1701_s11 }
 0x1c4   : > { %p1703_p7 = pnand %p1702_p5, %p1623_p6 }
 0x1c5   : > { %p1710_p11 = por %p1709_p10, %p1708_p9 }
 0x1c6   : > { %p1704_p8 = pneg %p1703_p7 }
 0x1c8   : > { %p1711_p12 = pnand %p1710_p11, %p1704_p8 }
 0x1ca   : > { %1714 = shalt.err (!%p1711_p12)
}
 0x1cb   : > { %s1715_s15 = scalar_lea.hbm %s2389_s6, 16 }
 0x1cc   : > { %p1716_p13 = scmp.ne.s32.totalorder %s2389_s6, %s1715_s15  ;;  %p1721_p2 = scmp.lt.u32.totalorder %s1715_s15, %s2389_s6 }
 0x1ce   : > { %p1717_p0 = pnand %p1716_p13, %p1623_p6 }
 0x1d0   : > { %p1718_p1 = pneg %p1717_p0 }
 0x1d2   : > { %p1723_p3 = pnand %p1721_p2, %p1718_p1 }
 0x1d4   : > { %1726 = shalt.err (!%p1723_p3)
}
 0x1d5   : > { %1618 = dma.vmem_to_hbm [thread:$0]  (%p1623_p6), %s1344_s23, 16, %s2389_s6, [#allocation7]  }
 0x1d6   : > { %1732 = dma.done.wait (%p1623_p6), [#allocation5], 16  }
 0x1d7   : > { %1734 = vsyncadd (%p1623_p6), [#allocation5], 4294967280 }
 0x1d8   : > { %1736 = dma.done.wait (%p1623_p6), [#allocation7], 16  }
 0x1d9   : > { %1738 = vsyncadd (%p1623_p6), [#allocation7], 4294967280 }
 0x1da PF: > { %s19_s21 = sadd.s32 1, %s1741_s21  }
 0x1db   : > { %p16_p4 = scmp.ge.s32.totalorder %s19_s21, 6  }
 0x1dd   :  { %18 = sbr.rel (!%p16_p4) target bundleno = 2 (0x2), region = 91 }
 0x1e4   :  { %1368 = vsyncpa [#allocation5], 1 }
 0x1e5   :  { %1370 = vsyncpa [#allocation5 + $0x1], 1 }
 0x1e6   :  { %1371 = vsyncpa [#allocation7], 1 }

</bundles_post_ra>
